<compile_context>
chip_gen: v6e
topology: v6e:2x2x1
jax: 0.10.0
libtpu: 0.0.40
codegen_flags: <defaults>
</compile_context>

<pallas_src>
import jax
import jax.numpy as jnp
from jax.experimental import pallas as pl
from jax.experimental.pallas import tpu as pltpu


def _round_up(x, m):
    return ((x + m - 1) // m) * m


def disc_kernel(s_ref, a_ref, l_ref,
                w1s_ref, w1a_ref, w1l_ref, b1_ref,
                w2t_ref, b2_ref, w3t_ref, b3_ref, o_ref):
    """One batch tile; output is a lane-dense (1, TB) row of logits."""
    # Layer 1 (natural orientation, no concat):
    #   concat([s, a, l]) @ W1 == s @ W1_s + a @ W1_a + l @ W1_l
    z1 = (jnp.dot(s_ref[...], w1s_ref[...], preferred_element_type=jnp.float32)
          + jnp.dot(a_ref[...], w1a_ref[...], preferred_element_type=jnp.float32)
          + jnp.dot(l_ref[...], w1l_ref[...], preferred_element_type=jnp.float32))

    # Switch to lane-dense (hidden, TB) layout for the rest of the network:
    # one small XLU transpose of (TB, h1); tanh / bias-adds then touch ~4x
    # fewer vregs and layers 2/3 are natural W^T @ x matmuls.
    z1t = jnp.transpose(z1)                                   # (h1, TB)
    h1t = jnp.tanh(z1t + b1_ref[...])                         # b1 is (h1, 1)

    h2t = jnp.tanh(jnp.dot(w2t_ref[...], h1t,
                           preferred_element_type=jnp.float32)
                   + b2_ref[...])                             # (h2, TB)

    out = jnp.dot(w3t_ref[...], h2t,
                  preferred_element_type=jnp.float32) + b3_ref[...]   # (1, TB)
    o_ref[...] = out.astype(o_ref.dtype)


def _choose_tb(batch, block_batch, min_steps=8):
    """Pick a 128-aligned batch tile giving a multi-step (pipelined) grid."""
    if batch < 128:
        # Single block equal to the full batch dim (satisfies BlockSpec rules).
        return batch
    tb = max(128, _round_up(pl.cdiv(batch, min_steps), 128))
    tb = min(tb, max(128, _round_up(block_batch, 128)))
    return tb


def disc_forward(states, actions, log_pis, params, *, block_batch=1024):
    """Pallas forward pass; returns logits of shape (B, 1)."""
    w1, b1, w2, b2, w3, b3 = params
    B, obs_dim = states.shape
    act_dim = actions.shape[-1]
    h1 = w1.shape[1]
    h2 = w2.shape[1]

    # Split W1 by input source so the [B, in_dim] concat is never materialized.
    w1_s = w1[:obs_dim]
    w1_a = w1[obs_dim:obs_dim + act_dim]
    w1_l = w1[obs_dim + act_dim:]
    # Transposed weights / column biases for the lane-dense (h, TB) dataflow.
    b1_c = b1.reshape(h1, 1)
    w2_t = w2.T                      # (h2, h1)
    b2_c = b2.reshape(h2, 1)
    w3_t = w3.T.reshape(1, h2)       # (1, h2)
    b3_s = b3.reshape(1, 1)

    tb = _choose_tb(B, block_batch)
    grid = (pl.cdiv(B, tb),)         # ragged last block allowed: no jnp.pad

    in_dim = obs_dim + 2 * act_dim
    bytes_in = states.dtype.itemsize
    cost = pl.CostEstimate(
        flops=int(2 * B * (in_dim * h1 + h1 * h2 + h2)),
        transcendentals=int(B * (h1 + h2)),
        bytes_accessed=int(B * (in_dim * bytes_in + 4)
                           + sum(int(p.size) * p.dtype.itemsize for p in params)),
    )

    def row_spec(cols):
        return pl.BlockSpec((tb, cols), lambda i: (i, 0))

    def const_spec(shape):
        return pl.BlockSpec(shape, lambda i: (0, 0))

    out_row = pl.pallas_call(
        disc_kernel,
        out_shape=jax.ShapeDtypeStruct((1, B), jnp.float32),
        grid=grid,
        in_specs=[
            row_spec(obs_dim),           # states tile
            row_spec(act_dim),           # actions tile
            row_spec(act_dim),           # log_pis tile
            const_spec((obs_dim, h1)),   # w1_s  (VMEM-resident across grid steps)
            const_spec((act_dim, h1)),   # w1_a
            const_spec((act_dim, h1)),   # w1_l
            const_spec((h1, 1)),         # b1 (column)
            const_spec((h2, h1)),        # w2^T
            const_spec((h2, 1)),         # b2 (column)
            const_spec((1, h2)),         # w3^T (row)
            const_spec((1, 1)),          # b3
        ],
        out_specs=pl.BlockSpec((1, tb), lambda i: (0, i)),
        compiler_params=pltpu.CompilerParams(
            dimension_semantics=("parallel",)),
        cost_estimate=cost,
    )(states, actions, log_pis, w1_s, w1_a, w1_l, b1_c, w2_t, b2_c, w3_t, b3_s)

    # (1, B) -> (B, 1) is a pure reshape (same row-major element order).
    return out_row.reshape(B, 1)


def disc_d(states, actions, log_pis, params):
    """Equivalent of Disc.d: sigmoid of the logits (glue op in plain JAX)."""
    return jax.nn.sigmoid(disc_forward(states, actions, log_pis, params))


def init_params(key, in_dim, hidden_sizes):
    """Deterministic synthetic init (Kaiming-uniform-like bounds, like nn.Linear)."""
    sizes = [in_dim] + list(hidden_sizes) + [1]
    params = []
    for j in range(len(sizes) - 1):
        fan_in, fan_out = sizes[j], sizes[j + 1]
        key, kw, kb = jax.random.split(key, 3)
        bound = 1.0 / (fan_in ** 0.5)
        w = jax.random.uniform(kw, (fan_in, fan_out), jnp.float32, -bound, bound)
        b = jax.random.uniform(kb, (1, fan_out), jnp.float32, -bound, bound)
        params += [w, b]
    return tuple(params)


def disc_forward_ref(states, actions, log_pis, params):
    """Pure-JAX f32 reference matching the PyTorch module."""
    x = jnp.concatenate([states, actions, log_pis], axis=-1)
    w1, b1, w2, b2, w3, b3 = params
    h1 = jnp.tanh(jnp.dot(x, w1) + b1)
    h2 = jnp.tanh(jnp.dot(h1, w2) + b2)
    return jnp.dot(h2, w3) + b3


if __name__ == "__main__":
    # Small shapes consistent with the module: states [B, obs_dim],
    # actions [B, act_dim], log_pis [B, act_dim].
    batch, obs_dim, act_dim = 256, 16, 4
    hidden_sizes = (32, 32)
    in_dim = obs_dim + 2 * act_dim

    key = jax.random.PRNGKey(0)
    k_s, k_a, k_l, k_p = jax.random.split(key, 4)
    states = jax.random.normal(k_s, (batch, obs_dim), jnp.float32)
    actions = jax.random.normal(k_a, (batch, act_dim), jnp.float32)
    log_pis = jax.random.normal(k_l, (batch, act_dim), jnp.float32)

    params = init_params(k_p, in_dim, hidden_sizes)

    # block_batch default; _choose_tb gives tb=128 here -> a 2-step grid that
    # exercises pipelining, the lane-dense output path and (ragged-capable)
    # partial-block handling machinery.
    out = disc_forward(states, actions, log_pis, params)
    out = jax.block_until_ready(out)
    assert out.shape == (batch, 1)

    ref = disc_forward_ref(states, actions, log_pis, params)
    assert jnp.allclose(out, ref, atol=1e-4, rtol=1e-4), (
        float(jnp.max(jnp.abs(out - ref))))

    print("KERNEL_OK")
</pallas_src>

<mosaic_0001>
module attributes {stable_mosaic.version = 11 : i64} {
  func.func @disc_kernel(%arg0: i32, %arg1: memref<128x16xf32, #tpu.memory_space<vmem>>, %arg2: memref<128x4xf32, #tpu.memory_space<vmem>>, %arg3: memref<128x4xf32, #tpu.memory_space<vmem>>, %arg4: memref<16x32xf32, #tpu.memory_space<vmem>>, %arg5: memref<4x32xf32, #tpu.memory_space<vmem>>, %arg6: memref<4x32xf32, #tpu.memory_space<vmem>>, %arg7: memref<32x1xf32, #tpu.memory_space<vmem>>, %arg8: memref<32x32xf32, #tpu.memory_space<vmem>>, %arg9: memref<32x1xf32, #tpu.memory_space<vmem>>, %arg10: memref<1x32xf32, #tpu.memory_space<vmem>>, %arg11: memref<1x1xf32, #tpu.memory_space<vmem>>, %arg12: memref<1x128xf32, #tpu.memory_space<vmem>>) attributes {dimension_semantics = [#tpu.dimension_semantics<parallel>], iteration_bounds = array<i64: 2>, scalar_prefetch = 0 : i64, scratch_operands = 0 : i64, tpu.core_type = #tpu.core_type<tc>, window_params = [{transform_indices = @transform_0, window_bounds = array<i64: 128, 16>}, {transform_indices = @transform_1, window_bounds = array<i64: 128, 4>}, {transform_indices = @transform_2, window_bounds = array<i64: 128, 4>}, {pipeline_mode = #tpu.pipeline_mode<synchronous>, transform_indices = @transform_3, window_bounds = array<i64: 16, 32>}, {pipeline_mode = #tpu.pipeline_mode<synchronous>, transform_indices = @transform_4, window_bounds = array<i64: 4, 32>}, {pipeline_mode = #tpu.pipeline_mode<synchronous>, transform_indices = @transform_5, window_bounds = array<i64: 4, 32>}, {pipeline_mode = #tpu.pipeline_mode<synchronous>, transform_indices = @transform_6, window_bounds = array<i64: 32, 1>}, {pipeline_mode = #tpu.pipeline_mode<synchronous>, transform_indices = @transform_7, window_bounds = array<i64: 32, 32>}, {pipeline_mode = #tpu.pipeline_mode<synchronous>, transform_indices = @transform_8, window_bounds = array<i64: 32, 1>}, {pipeline_mode = #tpu.pipeline_mode<synchronous>, transform_indices = @transform_9, window_bounds = array<i64: 1, 32>}, {pipeline_mode = #tpu.pipeline_mode<synchronous>, transform_indices = @transform_10, window_bounds = array<i64: 1, 1>}, {transform_indices = @transform_11, window_bounds = array<i64: 1, 128>}]} {
    %c0 = arith.constant 0 : index
    %c0_0 = arith.constant 0 : index
    %0 = vector.load %arg1[%c0, %c0_0] : memref<128x16xf32, #tpu.memory_space<vmem>>, vector<128x16xf32>
    %c0_1 = arith.constant 0 : index
    %c0_2 = arith.constant 0 : index
    %1 = vector.load %arg4[%c0_1, %c0_2] : memref<16x32xf32, #tpu.memory_space<vmem>>, vector<16x32xf32>
    %cst = arith.constant dense<0.000000e+00> : vector<128x32xf32>
    %2 = tpu.matmul %0, %1, %cst {dimension_numbers = #tpu.dot_dimension_numbers<[1], [0], [0], [1], [0, 0, 1, 1], [], []>} : vector<128x16xf32>, vector<16x32xf32>, vector<128x32xf32> -> vector<128x32xf32>
    %c0_3 = arith.constant 0 : index
    %c0_4 = arith.constant 0 : index
    %3 = vector.load %arg2[%c0_3, %c0_4] : memref<128x4xf32, #tpu.memory_space<vmem>>, vector<128x4xf32>
    %c0_5 = arith.constant 0 : index
    %c0_6 = arith.constant 0 : index
    %4 = vector.load %arg5[%c0_5, %c0_6] : memref<4x32xf32, #tpu.memory_space<vmem>>, vector<4x32xf32>
    %cst_7 = arith.constant dense<0.000000e+00> : vector<128x32xf32>
    %5 = tpu.matmul %3, %4, %cst_7 {dimension_numbers = #tpu.dot_dimension_numbers<[1], [0], [0], [1], [0, 0, 1, 1], [], []>} : vector<128x4xf32>, vector<4x32xf32>, vector<128x32xf32> -> vector<128x32xf32>
    %6 = arith.addf %2, %5 : vector<128x32xf32>
    %c0_8 = arith.constant 0 : index
    %c0_9 = arith.constant 0 : index
    %7 = vector.load %arg3[%c0_8, %c0_9] : memref<128x4xf32, #tpu.memory_space<vmem>>, vector<128x4xf32>
    %c0_10 = arith.constant 0 : index
    %c0_11 = arith.constant 0 : index
    %8 = vector.load %arg6[%c0_10, %c0_11] : memref<4x32xf32, #tpu.memory_space<vmem>>, vector<4x32xf32>
    %cst_12 = arith.constant dense<0.000000e+00> : vector<128x32xf32>
    %9 = tpu.matmul %7, %8, %cst_12 {dimension_numbers = #tpu.dot_dimension_numbers<[1], [0], [0], [1], [0, 0, 1, 1], [], []>} : vector<128x4xf32>, vector<4x32xf32>, vector<128x32xf32> -> vector<128x32xf32>
    %10 = arith.addf %6, %9 : vector<128x32xf32>
    %11 = tpu.transpose %10, [1, 0] : vector<128x32xf32> -> vector<32x128xf32>
    %c0_13 = arith.constant 0 : index
    %c0_14 = arith.constant 0 : index
    %12 = vector.load %arg7[%c0_13, %c0_14] : memref<32x1xf32, #tpu.memory_space<vmem>>, vector<32x1xf32>
    %13 = vector.broadcast %12 : vector<32x1xf32> to vector<32x128xf32>
    %14 = arith.addf %11, %13 : vector<32x128xf32>
    %15 = math.tanh %14 : vector<32x128xf32>
    %c0_15 = arith.constant 0 : index
    %c0_16 = arith.constant 0 : index
    %16 = vector.load %arg8[%c0_15, %c0_16] : memref<32x32xf32, #tpu.memory_space<vmem>>, vector<32x32xf32>
    %cst_17 = arith.constant dense<0.000000e+00> : vector<32x128xf32>
    %17 = tpu.matmul %16, %15, %cst_17 {dimension_numbers = #tpu.dot_dimension_numbers<[1], [0], [0], [1], [0, 0, 1, 1], [], []>} : vector<32x32xf32>, vector<32x128xf32>, vector<32x128xf32> -> vector<32x128xf32>
    %c0_18 = arith.constant 0 : index
    %c0_19 = arith.constant 0 : index
    %18 = vector.load %arg9[%c0_18, %c0_19] : memref<32x1xf32, #tpu.memory_space<vmem>>, vector<32x1xf32>
    %19 = vector.broadcast %18 : vector<32x1xf32> to vector<32x128xf32>
    %20 = arith.addf %17, %19 : vector<32x128xf32>
    %21 = math.tanh %20 : vector<32x128xf32>
    %c0_20 = arith.constant 0 : index
    %c0_21 = arith.constant 0 : index
    %22 = vector.load %arg10[%c0_20, %c0_21] : memref<1x32xf32, #tpu.memory_space<vmem>>, vector<1x32xf32>
    %cst_22 = arith.constant dense<0.000000e+00> : vector<1x128xf32>
    %23 = tpu.matmul %22, %21, %cst_22 {dimension_numbers = #tpu.dot_dimension_numbers<[1], [0], [0], [1], [0, 0, 1, 1], [], []>} : vector<1x32xf32>, vector<32x128xf32>, vector<1x128xf32> -> vector<1x128xf32>
    %c0_23 = arith.constant 0 : index
    %c0_24 = arith.constant 0 : index
    %24 = vector.load %arg11[%c0_23, %c0_24] : memref<1x1xf32, #tpu.memory_space<vmem>>, vector<1x1xf32>
    %25 = vector.broadcast %24 : vector<1x1xf32> to vector<1x128xf32>
    %26 = arith.addf %23, %25 : vector<1x128xf32>
    %c0_25 = arith.constant 0 : index
    %c0_26 = arith.constant 0 : index
    %27 = vector.load %arg12[%c0_25, %c0_26] : memref<1x128xf32, #tpu.memory_space<vmem>>, vector<1x128xf32>
    tpu.vector_store %arg12[%c0_25, %c0_26], %26 {strides = array<i32>} : memref<1x128xf32, #tpu.memory_space<vmem>>, vector<1x128xf32>,
    return
  }
  func.func @transform_0(%arg0: i32) -> (i32, i32) {
    %c0_i32 = arith.constant 0 : i32
    %c0_i32_0 = arith.constant 0 : i32
    return %arg0, %c0_i32 : i32, i32
  }
  func.func @transform_1(%arg0: i32) -> (i32, i32) {
    %c0_i32 = arith.constant 0 : i32
    %c0_i32_0 = arith.constant 0 : i32
    return %arg0, %c0_i32 : i32, i32
  }
  func.func @transform_2(%arg0: i32) -> (i32, i32) {
    %c0_i32 = arith.constant 0 : i32
    %c0_i32_0 = arith.constant 0 : i32
    return %arg0, %c0_i32 : i32, i32
  }
  func.func @transform_3(%arg0: i32) -> (i32, i32) {
    %c0_i32 = arith.constant 0 : i32
    %c0_i32_0 = arith.constant 0 : i32
    %c0_i32_1 = arith.constant 0 : i32
    return %c0_i32, %c0_i32_0 : i32, i32
  }
  func.func @transform_4(%arg0: i32) -> (i32, i32) {
    %c0_i32 = arith.constant 0 : i32
    %c0_i32_0 = arith.constant 0 : i32
    %c0_i32_1 = arith.constant 0 : i32
    return %c0_i32, %c0_i32_0 : i32, i32
  }
  func.func @transform_5(%arg0: i32) -> (i32, i32) {
    %c0_i32 = arith.constant 0 : i32
    %c0_i32_0 = arith.constant 0 : i32
    %c0_i32_1 = arith.constant 0 : i32
    return %c0_i32, %c0_i32_0 : i32, i32
  }
  func.func @transform_6(%arg0: i32) -> (i32, i32) {
    %c0_i32 = arith.constant 0 : i32
    %c0_i32_0 = arith.constant 0 : i32
    %c0_i32_1 = arith.constant 0 : i32
    return %c0_i32, %c0_i32_0 : i32, i32
  }
  func.func @transform_7(%arg0: i32) -> (i32, i32) {
    %c0_i32 = arith.constant 0 : i32
    %c0_i32_0 = arith.constant 0 : i32
    %c0_i32_1 = arith.constant 0 : i32
    return %c0_i32, %c0_i32_0 : i32, i32
  }
  func.func @transform_8(%arg0: i32) -> (i32, i32) {
    %c0_i32 = arith.constant 0 : i32
    %c0_i32_0 = arith.constant 0 : i32
    %c0_i32_1 = arith.constant 0 : i32
    return %c0_i32, %c0_i32_0 : i32, i32
  }
  func.func @transform_9(%arg0: i32) -> (i32, i32) {
    %c0_i32 = arith.constant 0 : i32
    %c0_i32_0 = arith.constant 0 : i32
    %c0_i32_1 = arith.constant 0 : i32
    return %c0_i32, %c0_i32_0 : i32, i32
  }
  func.func @transform_10(%arg0: i32) -> (i32, i32) {
    %c0_i32 = arith.constant 0 : i32
    %c0_i32_0 = arith.constant 0 : i32
    %c0_i32_1 = arith.constant 0 : i32
    return %c0_i32, %c0_i32_0 : i32, i32
  }
  func.func @transform_11(%arg0: i32) -> (i32, i32) {
    %c0_i32 = arith.constant 0 : i32
    %c0_i32_0 = arith.constant 0 : i32
    return %c0_i32, %arg0 : i32, i32
  }
}

</mosaic_0001>

<bundles_post_ra>
// kernel: tpu_custom_call.1
= control target key start
LH: loop header
LB: loop body
LE: loop exit
PB: predicated region body
PF: predicated region fallthrough
CT: control target
= control target key end

     0   :  { %s2167_s0 = inlined_call_operand.vmem [shape: f32[256,16], index: 0, kind: input, shape index: {}]   ;;  %s2168_s1 = inlined_call_operand.vmem [shape: f32[256,4], index: 1, kind: input, shape index: {}]   ;;  %s2169_s2 = inlined_call_operand.vmem [shape: f32[256,4], index: 2, kind: input, shape index: {}]   ;;  %s2170_s3 = inlined_call_operand.vmem [shape: f32[16,32], index: 3, kind: input, shape index: {}]   ;;  %s2171_s4 = inlined_call_operand.vmem [shape: f32[4,32], index: 4, kind: input, shape index: {}]   ;;  %s2172_s5 = inlined_call_operand.vmem [shape: f32[4,32], index: 5, kind: input, shape index: {}]   ;;  %s2173_s6 = inlined_call_operand.vmem [shape: f32[32,1], index: 6, kind: input, shape index: {}]   ;;  %s2174_s7 = inlined_call_operand.vmem [shape: f32[32,32], index: 7, kind: input, shape index: {}]   ;;  %s2175_s8 = inlined_call_operand.vmem [shape: f32[32,1], index: 8, kind: input, shape index: {}]   ;;  %s2176_s9 = inlined_call_operand.vmem [shape: f32[1,32], index: 9, kind: input, shape index: {}]   ;;  %s2177_s10 = inlined_call_operand.<no memory space> [shape: f32[1,1], index: 10, kind: input, shape index: {}]   ;;  %s2178_s11 = inlined_call_operand.hbm [shape: f32[1,256], index: 11, kind: output, shape index: {}]  }
   0x1   :  { %v16_v0 = vstv %s2177_s10 }
   0x2   :  { %17 = vst [vmem:[#allocation2] sm:$0x1] %v16_v0 }
   0x3   :  { %18 = vsyncpa [#allocation4], 0 }
   0x4   :  { %20 = vsyncpa [#allocation4 + $0x1], 0  ;;  %s1888_s19 = smov 0   ;;  %s1890_s20 = smov 0  }
   0x5   :  { %s1892_s21 = smov 0   ;;  %s1894_s22 = smov 0  }
   0x6 LB: > { %s1458_s10 = sadd.s32 4294967295, %s1819_s22   ;;  %s1459_s23 = sadd.s32 4294967294, %s1819_s22   ;;  %s1819_s22 = sphi %s1894_s22, %s2184_s22   ;;  %s1815_s21 = sphi %s1892_s21, %s2183_s21   ;;  %s1811_s20 = sphi %s1890_s20, %s2182_s20   ;;  %s1807_s19 = sphi %s1888_s19, %s2181_s19  }
   0x7   : > { %s1911_s24 = sadd.s32 1, %s1819_s22   ;;  %s279_s25 = sadd.s32 1, %s1815_s21 }
   0x8   : > { %s276_s26 = ssub.s32 %s1819_s22, %s1911_s24  ;;  %p289_p0 = scmp.ne.s32.totalorder %s1815_s21, %s1811_s20 }
   0x9   : > { %p277_p1 = scmp.eq.s32.totalorder %s276_s26, 0  ;;  %p290_p2 = scmp.eq.s32.totalorder %s1458_s10, 1 }
   0xa   : > { %p295_p3 = scmp.ne.s32.totalorder %s1811_s20, %s1807_s19  ;;  %p296_p4 = scmp.eq.s32.totalorder %s1459_s23, 1 }
   0xb   : > { %s1921_s27 = scalar_select %p277_p1, %s1815_s21, %s279_s25  }
   0xc   : > { %p1923_p5 = por %p290_p2, %p289_p0  ;;  %p1927_p6 = por %p296_p4, %p295_p3 }
   0xd   : > { %p1462_p7 = scmp.ge.s32.totalorder %s1819_s22, 1  ;;  %p365_p8 = scmp.lt.s32.totalorder %s1819_s22, 3 }
   0xf   : > { %p366_p9 = pnand %p1462_p7, %p365_p8 }
  0x10   : > { %s1936_s13 = sshll.u32 (!%p366_p9), %s1458_s10, 4  ;;  %s1824_s26 = smov (!%p366_p9), [#allocation3]  }
  0x11   : > { %369 = sbr.rel (%p366_p9) target bundleno = 838 (0x346), region = 64  ;;  %p415_p10 = scmp.lt.s32.totalorder (!%p366_p9), %s1936_s13, 31 }
  0x12   : > { %s1763_s30 = sshll.u32 (!%p366_p9), %s1824_s26, 4  ;;  %s1764_s30 = int_to_ptr.vmem [resolvable:$false] %s1763_s30 }
  0x16   : > { %v466_v1 = vld [vmem:[%s2171_s4] sm:$0xf]  ;;  %vm516_vm0 = vcmask 1043456   ;;  %v449_v2 = vld [vmem:[%s2170_s3 + $0x8] sm:$0xff]  ;;  %v1123_v4 = vld [vmem:[%s2173_s6 + $0x18] sm:$0xff]  ;;  %s416_s23 = scalar_select %p415_p10, %s1936_s13, 31 }
  0x17   : > { %1592 = vmatprep.subr.msk.mxu0 %vm516_vm0, %v466_v1  ;;  %1697 = vmatprep.subr.msk.mxu1 %vm516_vm0, %v466_v1  ;;  %v875_v3 = vld [vmem:[%s2172_s5] sm:$0xf]  ;;  %v1821_v5 = vmov 0   ;;  %vm467_vm1 = vcmask 31744   ;;  %v1122_v13 = vld [vmem:[%s2173_s6 + $0x10] sm:$0xff]  ;;  %vm665_vm2 = vcmask 130048  }
  0x18   : > { %1593 = vmatpush3.msk.msra.mxu0 %vm516_vm0, %v466_v1  ;;  %1698 = vmatpush3.msk.msra.mxu1 %vm516_vm0, %v466_v1  ;;  %s1954_s25 = sshll.u32 %s416_s23, 3  ;;  %v448_v12 = vld [vmem:[%s2170_s3] sm:$0xff]  ;;  %v1121_v56 = vld [vmem:[%s2173_s6 + $0x8] sm:$0xff]  ;;  %v1159_v58 = vld [vmem:[%s2175_s8 + $0x18] sm:$0xff]  ;;  %vm1180_vm3 = vcmask 261120   ;;  %vm1823_vm4 = vmmov 0  }
  0x19   : > { %1618 = vmatprep.subr.mxu1 %v449_v2  ;;  %1646 = vmatprep.subr.msk.mxu0 %vm516_vm0, %v875_v3  ;;  %s1960_s12 = scalar_lea.vmem %s2168_s1, %s1954_s25  ;;  %s1979_s18 = scalar_lea.vmem %s2167_s0, %s1954_s25  ;;  %v1120_v57 = vld [vmem:[%s2173_s6] sm:$0xff]  ;;  %v1158_v59 = vld [vmem:[%s2175_s8 + $0x10] sm:$0xff]  ;;  %v1157_v60 = vld [vmem:[%s2175_s8 + $0x8] sm:$0xff] }
  0x1a   : > { %1741 = vset.pattern.permute.xlu0 %v1821_v5  ;;  %1742 = vset.pattern.permute.xlu1 %v1821_v5  ;;  %v450_v6 = vld [vmem:[%s1960_s12] sm:$0xff]  ;;  %v451_v8 = vld [vmem:[%s1960_s12 + $0x8] sm:$0xff]  ;;  %v452_v10 = vld [vmem:[%s1960_s12 + $0x10] sm:$0xff]  ;;  %s2019_s14 = scalar_lea.vmem %s2169_s2, %s1954_s25  ;;  %s412_s25 = sand.u32 1, %s1811_s20  }
  0x1b   : > { %1141 = vperm.xlu0 %1741, %v1123_v4   ;;  %v462_v7 = vld [vmem:[%s1960_s12 + $0x60] sm:$0xff]  ;;  %1594 = vmatprep.mubr.msk.f32.mxu0 %vm467_vm1, %v450_v6  ;;  %v463_v9 = vld [vmem:[%s1960_s12 + $0x68] sm:$0xff]  ;;  %v464_v11 = vld [vmem:[%s1960_s12 + $0x70] sm:$0xff]  ;;  %s1368_s10 = scalar_lea.sflag [#allocation4], %s412_s25 }
  0x1c   : > { %1612 = vmatprep.mubr.msk.f32.mxu1 %vm467_vm1, %v462_v7  ;;  %1595 = vmatmul.mubr.msk.f32.vlgmr.msra.gmra.mxu0 %vm467_vm1, %v451_v8  ;;  %v453_v14 = vld [vmem:[%s1960_s12 + $0x18] sm:$0xff]  ;;  %v454_v16 = vld [vmem:[%s1960_s12 + $0x20] sm:$0xff]  ;;  %v455_v18 = vld [vmem:[%s1960_s12 + $0x28] sm:$0xff] }
  0x1d   : > { %1613 = vmatmul.mubr.msk.f32.vlgmr.msra.gmra.mxu1 %vm467_vm1, %v463_v9  ;;  %1597 = vmatprep.mubr.msk.f32.mxu0 %vm467_vm1, %v452_v10  ;;  %v465_v15 = vld [vmem:[%s1960_s12 + $0x78] sm:$0xff]  ;;  %v432_v17 = vld [vmem:[%s1979_s18] sm:$0xff]  ;;  %v433_v19 = vld [vmem:[%s1979_s18 + $0x8] sm:$0xff] }
  0x1e   : > { %1615 = vmatprep.mubr.msk.f32.mxu1 %vm467_vm1, %v464_v11  ;;  %1619 = vmatpush3.msra.mxu1 %v449_v2  ;;  %v456_v20 = vld [vmem:[%s1960_s12 + $0x30] sm:$0xff]  ;;  %v457_v22 = vld [vmem:[%s1960_s12 + $0x38] sm:$0xff]  ;;  %v458_v24 = vld [vmem:[%s1960_s12 + $0x40] sm:$0xff] }
  0x1f   : > { %1647 = vmatpush3.msk.msra.mxu0 %vm516_vm0, %v875_v3  ;;  %1620 = vmatprep.subr.mxu1 %v448_v12  ;;  %v434_v21 = vld [vmem:[%s1979_s18 + $0x10] sm:$0xff]  ;;  %v435_v23 = vld [vmem:[%s1979_s18 + $0x18] sm:$0xff]  ;;  %v436_v25 = vld [vmem:[%s1979_s18 + $0x20] sm:$0xff] }
  0x20   : > { %1136 = vperm.xlu0 %1741, %v1122_v13   ;;  %1598 = vmatmul.mubr.msk.f32.gmra.mxu0 %vm467_vm1, %v453_v14  ;;  %v459_v26 = vld [vmem:[%s1960_s12 + $0x48] sm:$0xff]  ;;  %v460_v28 = vld [vmem:[%s1960_s12 + $0x50] sm:$0xff]  ;;  %v461_v30 = vld [vmem:[%s1960_s12 + $0x58] sm:$0xff]  ;;  %s413_s12 = scalar_lea.vmem [#allocation3], %s412_s25 }
  0x21   : > { %1616 = vmatmul.mubr.msk.f32.gmra.mxu1 %vm467_vm1, %v465_v15  ;;  %1600 = vmatprep.mubr.msk.f32.mxu0 %vm467_vm1, %v454_v16  ;;  %v437_v27 = vld [vmem:[%s1979_s18 + $0x28] sm:$0xff]  ;;  %v438_v29 = vld [vmem:[%s1979_s18 + $0x30] sm:$0xff]  ;;  %v439_v31 = vld [vmem:[%s1979_s18 + $0x38] sm:$0xff]  ;;  %s1380_s15 = sshll.u32 %s413_s12, 4  ;;  %s1381_s15 = int_to_ptr.vmem [resolvable:$true] %s1380_s15 }
  0x22   : > { %1621 = vmatpush3.msra.mxu1 %v448_v12  ;;  %1622 = vmatprep.mubr.msk.f32.mxu1 %vm665_vm2, %v432_v17  ;;  %v440_v32 = vld [vmem:[%s1979_s18 + $0x40] sm:$0xff]  ;;  %v441_v34 = vld [vmem:[%s1979_s18 + $0x48] sm:$0xff]  ;;  %v442_v36 = vld [vmem:[%s1979_s18 + $0x50] sm:$0xff]  ;;  %s1759_s23 = scalar_lea.vmem %s1381_s15, 16  ;;  %p1766_p0 = scmp.lt.s32.totalorder %s1381_s15, %s1764_s30 }
  0x23   : > { %v859_v33 = vld [vmem:[%s2019_s14] sm:$0xff]  ;;  %v860_v35 = vld [vmem:[%s2019_s14 + $0x8] sm:$0xff]  ;;  %v861_v37 = vld [vmem:[%s2019_s14 + $0x10] sm:$0xff]  ;;  %1131 = vperm.xlu1 %1742, %v1121_v56   ;;  %p1760_p11 = scmp.ne.s32.totalorder %s1381_s15, %s1759_s23 }
  0x24   : > { %1601 = vmatmul.mubr.msk.f32.gmra.mxu0 %vm467_vm1, %v455_v18  ;;  %v443_v38 = vld [vmem:[%s1979_s18 + $0x58] sm:$0xff]  ;;  %v444_v40 = vld [vmem:[%s1979_s18 + $0x60] sm:$0xff]  ;;  %v445_v42 = vld [vmem:[%s1979_s18 + $0x68] sm:$0xff] }
  0x25   : > { %1623 = vmatmul.mubr.msk.f32.vlgmr.msra.gmra.mxu1 %vm665_vm2, %v433_v19  ;;  %1603 = vmatprep.mubr.msk.f32.mxu0 %vm467_vm1, %v456_v20  ;;  %v862_v39 = vld [vmem:[%s2019_s14 + $0x18] sm:$0xff]  ;;  %v863_v41 = vld [vmem:[%s2019_s14 + $0x20] sm:$0xff]  ;;  %v864_v43 = vld [vmem:[%s2019_s14 + $0x28] sm:$0xff]  ;;  %p1761_p12 = pnand %p1760_p11, %p1923_p5 }
  0x26   : > { %1625 = vmatprep.mubr.msk.f32.mxu1 %vm665_vm2, %v434_v21  ;;  %v446_v44 = vld [vmem:[%s1979_s18 + $0x70] sm:$0xff]  ;;  %v447_v46 = vld [vmem:[%s1979_s18 + $0x78] sm:$0xff]  ;;  %v867_v48 = vld [vmem:[%s2019_s14 + $0x40] sm:$0xff]  ;;  %s2132_s18 = scalar_lea.hbm %s2178_s11, %s1936_s13 }
  0x27   : > { %v865_v45 = vld [vmem:[%s2019_s14 + $0x30] sm:$0xff]  ;;  %v866_v47 = vld [vmem:[%s2019_s14 + $0x38] sm:$0xff]  ;;  %v868_v49 = vld [vmem:[%s2019_s14 + $0x48] sm:$0xff]  ;;  %1126 = vperm.xlu1 %1742, %v1120_v57   ;;  %p1762_p13 = pneg %p1761_p12 }
  0x28   : > { %1604 = vmatmul.mubr.msk.f32.gmra.mxu0 %vm467_vm1, %v457_v22  ;;  %v869_v50 = vld [vmem:[%s2019_s14 + $0x50] sm:$0xff]  ;;  %v870_v51 = vld [vmem:[%s2019_s14 + $0x58] sm:$0xff]  ;;  %v871_v52 = vld [vmem:[%s2019_s14 + $0x60] sm:$0xff] }
  0x29   : > { %1626 = vmatmul.mubr.msk.f32.gmra.mxu1 %vm665_vm2, %v435_v23  ;;  %1606 = vmatprep.mubr.msk.f32.mxu0 %vm467_vm1, %v458_v24  ;;  %v872_v53 = vld [vmem:[%s2019_s14 + $0x68] sm:$0xff]  ;;  %v873_v54 = vld [vmem:[%s2019_s14 + $0x70] sm:$0xff]  ;;  %v874_v55 = vld [vmem:[%s2019_s14 + $0x78] sm:$0xff]  ;;  %s1765_s14 = scalar_lea.vmem %s1764_s30, 32 }
  0x2a   : > { %1628 = vmatprep.mubr.msk.f32.mxu1 %vm665_vm2, %v436_v25  ;;  %v1156_v61 = vld [vmem:[%s2175_s8] sm:$0xff]  ;;  %p1767_p1 = scmp.lt.s32.totalorder %s1765_s14, %s1759_s23 }
  0x2b   : > { %1177 = vperm.xlu1 %1742, %v1159_v58   ;;  %v1283_v62 = vld [vmem:[#allocation2] sm:$0x1] }
  0x2c   : > { %1607 = vmatmul.mubr.msk.f32.gmra.mxu0 %vm467_vm1, %v459_v26  ;;  %p1768_p2 = por %p1767_p1, %p1766_p0 }
  0x2d   : > { %1629 = vmatmul.mubr.msk.f32.gmra.mxu1 %vm665_vm2, %v437_v27  ;;  %1609 = vmatprep.mubr.msk.f32.mxu0 %vm467_vm1, %v460_v28 }
  0x2e   : > { %1631 = vmatprep.mubr.msk.f32.mxu1 %vm665_vm2, %v438_v29  ;;  %p1769_p3 = pnand %p1768_p2, %p1762_p13 }
  0x2f   : > { %1172 = vperm.xlu1 %1742, %v1158_v59  }
  0x30   : > { %1610 = vmatmul.mubr.msk.f32.gmra.mxu0 %vm467_vm1, %v461_v30 }
  0x31   : > { %1632 = vmatmul.mubr.msk.f32.gmra.mxu1 %vm665_vm2, %v439_v31  ;;  %1648 = vmatprep.mubr.msk.f32.mxu0 %vm467_vm1, %v859_v33 }
  0x32   : > { %1634 = vmatprep.mubr.msk.f32.mxu1 %vm665_vm2, %v440_v32 }
  0x33   : > { %1167 = vperm.xlu1 %1742, %v1157_v60  }
  0x34   : > { %1649 = vmatmul.mubr.msk.f32.vlgmr.msra.gmra.mxu0 %vm467_vm1, %v860_v35 }
  0x35   : > { %1635 = vmatmul.mubr.msk.f32.gmra.mxu1 %vm665_vm2, %v441_v34  ;;  %1651 = vmatprep.mubr.msk.f32.mxu0 %vm467_vm1, %v861_v37 }
  0x36   : > { %1637 = vmatprep.mubr.msk.f32.mxu1 %vm665_vm2, %v442_v36 }
  0x37   : > { %1162 = vperm.xlu1 %1742, %v1156_v61  }
  0x38   : > { %1652 = vmatmul.mubr.msk.f32.gmra.mxu0 %vm467_vm1, %v862_v39 }
  0x39   : > { %1638 = vmatmul.mubr.msk.f32.gmra.mxu1 %vm665_vm2, %v443_v38  ;;  %1654 = vmatprep.mubr.msk.f32.mxu0 %vm467_vm1, %v863_v41 }
  0x3a   : > { %1640 = vmatprep.mubr.msk.f32.mxu1 %vm665_vm2, %v444_v40 }
  0x3b   : > { %1286 = vperm.xlu1 %1742, %v1283_v62  }
  0x3c   : > { %1655 = vmatmul.mubr.msk.f32.gmra.mxu0 %vm467_vm1, %v864_v43 }
  0x3d   : > { %1641 = vmatmul.mubr.msk.f32.gmra.mxu1 %vm665_vm2, %v445_v42  ;;  %1657 = vmatprep.mubr.msk.f32.mxu0 %vm467_vm1, %v865_v45 }
  0x3e   : > { %1643 = vmatprep.mubr.msk.f32.mxu1 %vm665_vm2, %v446_v44 }
  0x40   : > { %1658 = vmatmul.mubr.msk.f32.gmra.mxu0 %vm467_vm1, %v866_v47 }
  0x41   : > { %1644 = vmatmul.mubr.msk.f32.gmra.mxu1 %vm665_vm2, %v447_v46  ;;  %1660 = vmatprep.mubr.msk.f32.mxu0 %vm467_vm1, %v867_v48 }
  0x44   : > { %1661 = vmatmul.mubr.msk.f32.gmra.mxu0 %vm467_vm1, %v868_v49 }
  0x45   : > { %1663 = vmatprep.mubr.msk.f32.mxu0 %vm467_vm1, %v869_v50 }
  0x48   : > { %1664 = vmatmul.mubr.msk.f32.gmra.mxu0 %vm467_vm1, %v870_v51 }
  0x49   : > { %1666 = vmatprep.mubr.msk.f32.mxu0 %vm467_vm1, %v871_v52 }
  0x4c   : > { %1667 = vmatmul.mubr.msk.f32.gmra.mxu0 %vm467_vm1, %v872_v53 }
  0x4d   : > { %1669 = vmatprep.mubr.msk.f32.mxu0 %vm467_vm1, %v873_v54 }
  0x50   : > { %1670 = vmatmul.mubr.msk.f32.gmra.mxu0 %vm467_vm1, %v874_v55  ;;  %v1152_v55 = vld [vmem:[%s2174_s7] sm:$0xff] }
  0x51   : > { %1680 = vmatprep.mubr.msk.f32.mxu1 %vm1180_vm3, %v1152_v55 }
  0xdc   : > { %v1596_v63 = vpop.f32.mrf.mxu0 }
  0xdd   : > { %v2095_v0 = vpop.f32.mrf.mxu1 }
  0xde   : > { %v586_v1 = vpop.f32.mrf.mxu0 }
  0xdf   : > { %v2097_v3 = vpop.f32.mrf.mxu1 }
  0xe0   : > { %v1599_v2 = vpop.f32.mrf.mxu0 }
  0xe1   : > { %v2099_v6 = vpop.f32.mrf.mxu1 }
  0xe2   : > { %v596_v4 = vpop.f32.mrf.mxu0 }
  0xe3   : > { %v2101_v9 = vpop.f32.mrf.mxu1 }
  0xe4   : > { %v1602_v5 = vpop.f32.mrf.mxu0 }
  0xe5   : > { %v1624_v12 = vpop.f32.mrf.mxu1 }
  0xe6   : > { %v606_v7 = vpop.f32.mrf.mxu0  ;;  %v786_v23 = vadd.f32 %v1624_v12, %v1596_v63 }
  0xe7   : > { %v780_v15 = vpop.f32.mrf.mxu1 }
  0xe8   : > { %v1605_v8 = vpop.f32.mrf.mxu0  ;;  %v781_v18 = vadd.f32 %v780_v15, %v586_v1 }
  0xe9   : > { %v1627_v19 = vpop.f32.mrf.mxu1 }
  0xea   : > { %v616_v10 = vpop.f32.mrf.mxu0  ;;  %v796_v31 = vadd.f32 %v1627_v19, %v1599_v2 }
  0xeb   : > { %v790_v24 = vpop.f32.mrf.mxu1 }
  0xec   : > { %v1608_v11 = vpop.f32.mrf.mxu0  ;;  %v791_v27 = vadd.f32 %v790_v24, %v596_v4  ;;  %v1132_v24 = vpop.permute.xlu1 %1131 }
  0xed   : > { %v1630_v28 = vpop.f32.mrf.mxu1 }
  0xee   : > { %v626_v13 = vpop.f32.mrf.mxu0  ;;  %v806_v39 = vadd.f32 %v1630_v28, %v1602_v5 }
  0xef   : > { %v800_v32 = vpop.f32.mrf.mxu1 }
  0xf0   : > { %v1611_v14 = vpop.f32.mrf.mxu0  ;;  %v801_v35 = vadd.f32 %v800_v32, %v606_v7  ;;  %v1127_v28 = vpop.permute.xlu1 %1126  ;;  %v1153_v32 = vld [vmem:[%s2174_s7 + $0x8] sm:$0xff] }
  0xf1   : > { %v1633_v36 = vpop.f32.mrf.mxu1 }
  0xf2   : > { %v636_v16 = vpop.f32.mrf.mxu0  ;;  %v816_v47 = vadd.f32 %v1633_v36, %v1605_v8 }
  0xf3   : > { %v810_v40 = vpop.f32.mrf.mxu1 }
  0xf4   : > { %v1650_v17 = vpop.f32.mrf.mxu0  ;;  %v811_v43 = vadd.f32 %v810_v40, %v616_v10  ;;  %v1178_v36 = vpop.permute.xlu1 %1177 }
  0xf5   : > { %v1073_v25 = vadd.f32 %v1650_v17, %v786_v23  ;;  %v1636_v44 = vpop.f32.mrf.mxu1 }
  0xf6   : > { %v993_v20 = vpop.f32.mrf.mxu0  ;;  %v826_v56 = vadd.f32 %v1636_v44, %v1608_v11 }
  0xf7   : > { %v1072_v21 = vadd.f32 %v993_v20, %v781_v18  ;;  %v820_v48 = vpop.f32.mrf.mxu1 }
  0xf8   : > { %v1653_v22 = vpop.f32.mrf.mxu0  ;;  %v821_v51 = vadd.f32 %v820_v48, %v626_v13 }
  0xf9   : > { %1088 = vxpose.xlu0.b32.start [1/16] (narrow) %v1072_v21, 32  ;;  %v1075_v33 = vadd.f32 %v1653_v22, %v796_v31  ;;  %v1639_v52 = vpop.f32.mrf.mxu1 }
  0xfa   : > { %v1003_v26 = vpop.f32.mrf.mxu0  ;;  %v836_v1 = vadd.f32 %v1639_v52, %v1611_v14 }
  0xfb   : > { %v1074_v29 = vadd.f32 %v1003_v26, %v791_v27  ;;  %v830_v57 = vpop.f32.mrf.mxu1 }
  0xfc   : > { %v1656_v30 = vpop.f32.mrf.mxu0  ;;  %v831_v60 = vadd.f32 %v830_v57, %v636_v16 }
  0xfd   : > { %1089 = vxpose.xlu0.b32.cont [2/16] (narrow) %v1073_v25, 32  ;;  %v1077_v41 = vadd.f32 %v1656_v30, %v806_v39  ;;  %v1642_v61 = vpop.f32.mrf.mxu1 }
  0xfe   : > { %v1013_v34 = vpop.f32.mrf.mxu0  ;;  %v846_v12 = vadd.f32 %v1642_v61, %v2095_v0 }
  0xff   : > { %v1076_v37 = vadd.f32 %v1013_v34, %v801_v35  ;;  %v840_v2 = vpop.f32.mrf.mxu1  ;;  %v1155_v34 = vld [vmem:[%s2174_s7 + $0x18] sm:$0xff]  ;;  %v1822_v35 = vmov 0.0  }
 0x100   : > { %v1659_v38 = vpop.f32.mrf.mxu0  ;;  %v841_v7 = vadd.f32 %v840_v2, %v2097_v3  ;;  %v1142_v3 = vpop.permute.xlu0 %1141 }
 0x101   : > { %1090 = vxpose.xlu0.b32.cont [3/16] (narrow) %v1074_v29, 32  ;;  %v1079_v49 = vadd.f32 %v1659_v38, %v816_v47  ;;  %v1645_v8 = vpop.f32.mrf.mxu1 }
 0x102   : > { %v1023_v42 = vpop.f32.mrf.mxu0  ;;  %v856_v18 = vadd.f32 %v1645_v8, %v2099_v6 }
 0x103   : > { %v1078_v45 = vadd.f32 %v1023_v42, %v811_v43  ;;  %v850_v13 = vpop.f32.mrf.mxu1 }
 0x104   : > { %v1662_v46 = vpop.f32.mrf.mxu0  ;;  %v851_v17 = vadd.f32 %v850_v13, %v2101_v9  ;;  %v1137_v20 = vpop.permute.xlu0 %1136 }
 0x105   : > { %1091 = vxpose.xlu0.b32.cont [4/16] (narrow) %v1075_v33, 32  ;;  %v1081_v58 = vadd.f32 %v1662_v46, %v826_v56  ;;  %v1154_v33 = vld [vmem:[%s2174_s7 + $0x10] sm:$0xff] }
 0x106   : > { %v1033_v50 = vpop.f32.mrf.mxu0 }
 0x107   : > { %v1080_v53 = vadd.f32 %v1033_v50, %v821_v51  ;;  %v1282_v51 = vld [vmem:[%s2176_s9] sm:$0x1] }
 0x108   : > { %v1665_v54 = vpop.f32.mrf.mxu0 }
 0x109   : > { %1092 = vxpose.xlu0.b32.cont [5/16] (narrow) %v1076_v37, 32  ;;  %v1083_v4 = vadd.f32 %v1665_v54, %v836_v1  ;;  %v1173_v37 = vpop.permute.xlu1 %1172 }
 0x10a   : > { %v1043_v59 = vpop.f32.mrf.mxu0 }
 0x10b   : > { %v1082_v62 = vadd.f32 %v1043_v59, %v831_v60 }
 0x10c   : > { %v1668_v63 = vpop.f32.mrf.mxu0 }
 0x10d   : > { %1093 = vxpose.xlu0.b32.cont [6/16] (narrow) %v1077_v41, 32  ;;  %v1085_v15 = vadd.f32 %v1668_v63, %v846_v12  ;;  %v1168_v39 = vpop.permute.xlu1 %1167 }
 0x10e   : > { %v1053_v5 = vpop.f32.mrf.mxu0 }
 0x10f   : > { %v1084_v10 = vadd.f32 %v1053_v5, %v841_v7 }
 0x110   : > { %v1671_v11 = vpop.f32.mrf.mxu0 }
 0x111   : > { %1094 = vxpose.xlu0.b32.cont [7/16] (narrow) %v1078_v45, 32  ;;  %v1087_v19 = vadd.f32 %v1671_v11, %v856_v18  ;;  %v1163_v46 = vpop.permute.xlu1 %1162 }
 0x112   : > { %v1063_v16 = vpop.f32.mrf.mxu0 }
 0x113   : > { %v1086_v14 = vadd.f32 %v1063_v16, %v851_v17 }
 0x115   : > { %1095 = vxpose.xlu0.b32.cont [8/16] (narrow) %v1079_v49, 32  ;;  %v1287_v56 = vpop.permute.xlu1 %1286 }
 0x119   : > { %1096 = vxpose.xlu0.b32.cont [9/16] (narrow) %v1080_v53, 32  ;;  %v1289_v53 = vlaneseq }
 0x11b   : > { %v1290_v54 = vshrl.u32 %v1289_v53, 7 }
 0x11d   : > { %1097 = vxpose.xlu0.b32.cont [10/16] (narrow) %v1081_v58, 32  ;;  %v1291_v55 = vsub.s32 0, %v1290_v54 }
 0x11f   : > { %v1292_v57 = vrot.slane %v1287_v56, %v1291_v55 }
 0x121   : > { %1098 = vxpose.xlu0.b32.cont [11/16] (narrow) %v1082_v62, 32 }
 0x125   : > { %1099 = vxpose.xlu0.b32.cont [12/16] (narrow) %v1083_v4, 32 }
 0x129   : > { %1100 = vxpose.xlu0.b32.cont [13/16] (narrow) %v1084_v10, 32 }
 0x12d   : > { %1101 = vxpose.xlu0.b32.cont [14/16] (narrow) %v1085_v15, 32 }
 0x131   : > { %1102 = vxpose.xlu0.b32.cont [15/16] (narrow) %v1086_v14, 32 }
 0x135   : > { %1103 = vxpose.xlu0.b32.end [16/16] (narrow) %v1087_v19, 32 }
 0x175   : > { %v1104_v21 = vpop.trf.xlu0 }
 0x176   : > { %v1144_v9 = vadd.f32 %v1127_v28, %v1104_v21 }
 0x179   : > { %v1105_v22 = vpop.trf.xlu0 }
 0x17a   : > { %v1145_v27 = vadd.f32 %v1132_v24, %v1105_v22 }
 0x17d   : > { %v1106_v23 = vpop.trf.xlu0 }
 0x17e   : > { %v1146_v25 = vadd.f32 %v1137_v20, %v1106_v23 }
 0x181   : > { %v1107_v0 = vpop.trf.xlu0 }
 0x182   : > { %v1147_v26 = vadd.f32 %v1142_v3, %v1107_v0 }
 0x184   : > { %1743 = vtanh.f32 %v1147_v26 }
 0x185   : > { %1745 = vtanh.f32 %v1146_v25 }
 0x186   : > { %1747 = vtanh.f32 %v1145_v27 }
 0x187   : > { %1749 = vtanh.f32 %v1144_v9 }
 0x191   : > { %v1744_v6 = vpop.eup %1743 }
 0x192   : > { %1672 = vmatprep.subr.mxu1 %v1744_v6  ;;  %v1746_v29 = vpop.eup %1745 }
 0x193   : > { %1673 = vmatpush3.msra.mxu1 %v1744_v6  ;;  %v1748_v30 = vpop.eup %1747 }
 0x194   : > { %1674 = vmatprep.subr.mxu1 %v1746_v29  ;;  %v1750_v31 = vpop.eup %1749 }
 0x195   : > { %1675 = vmatpush3.msra.mxu1 %v1746_v29 }
 0x196   : > { %1676 = vmatprep.subr.mxu1 %v1748_v30 }
 0x197   : > { %1677 = vmatpush3.msra.mxu1 %v1748_v30 }
 0x198   : > { %1678 = vmatprep.subr.mxu1 %v1750_v31 }
 0x199   : > { %1679 = vmatpush3.msra.mxu1 %v1750_v31 }
 0x19a   : > { %1681 = vmatmul.mubr.msk.f32.vlgmr.msra.gmra.mxu1 %vm1180_vm3, %v1153_v32  ;;  %1686 = vmatprep.subr.mxu1 %v1822_v35 }
 0x19b   : > { %1683 = vmatprep.mubr.msk.f32.mxu1 %vm1180_vm3, %v1154_v33 }
 0x19e   : > { %1684 = vmatmul.mubr.msk.f32.gmra.mxu1 %vm1180_vm3, %v1155_v34 }
 0x19f   : > { %1694 = vmatprep.mubr.msk.f32.mxu1 %vm1823_vm4, %v1822_v35 }
 0x25a   : > { %v1682_v38 = vpop.f32.mrf.mxu1 }
 0x25b   : > { %v1265_v44 = vadd.f32 %v1682_v38, %v1168_v39 }
 0x25c   : > { %v1259_v40 = vpop.f32.mrf.mxu1 }
 0x25d   : > { %v1260_v47 = vadd.f32 %v1259_v40, %v1163_v46 }
 0x25e   : > { %v1685_v41 = vpop.f32.mrf.mxu1 }
 0x25f   : > { %v1275_v42 = vadd.f32 %v1685_v41, %v1178_v36 }
 0x260   : > { %v1269_v43 = vpop.f32.mrf.mxu1 }
 0x261   : > { %1751 = vtanh.f32 %v1275_v42  ;;  %v1270_v45 = vadd.f32 %v1269_v43, %v1173_v37 }
 0x263   : > { %1753 = vtanh.f32 %v1270_v45 }
 0x264   : > { %1755 = vtanh.f32 %v1265_v44 }
 0x265   : > { %1757 = vtanh.f32 %v1260_v47 }
 0x26e   : > { %v1752_v48 = vpop.eup %1751 }
 0x26f   : > { %1687 = vmatpush3.msra.mxu1 %v1752_v48 }
 0x270   : > { %v1754_v49 = vpop.eup %1753  ;;  %1688 = vmatprep.subr.mxu1 %v1822_v35 }
 0x271   : > { %1689 = vmatpush3.msra.mxu1 %v1754_v49  ;;  %v1756_v50 = vpop.eup %1755 }
 0x272   : > { %1690 = vmatprep.subr.mxu1 %v1822_v35  ;;  %v1758_v52 = vpop.eup %1757 }
 0x273   : > { %1691 = vmatpush3.msra.mxu1 %v1756_v50 }
 0x274   : > { %1692 = vmatprep.subr.mxu1 %v1822_v35 }
 0x275   : > { %1693 = vmatpush3.msra.mxu1 %v1758_v52 }
 0x276   : > { %1695 = vmatmul.mubr.msk.f32.vlgmr.msra.gmra.mxu1 %vm1180_vm3, %v1282_v51 }
 0x336   : > { %v1362_v58 = vpop.f32.mrf.mxu1 }
 0x337   : > { %v1363_v59 = vadd.f32 %v1362_v58, %v1292_v57 }
 0x338   : > { %v1696_v60 = vpop.f32.mrf.mxu1 }
 0x339   : > { %1366 = vst [vmem:[%s413_s12] sm:$0x1] %v1363_v59 }
 0x33a   : > { %1772 = shalt.err (!%p1769_p3)
}
 0x33b   : > { %s1773_s13 = scalar_lea.hbm %s2132_s18, 16  ;;  %s1777_s16 = scalar_lea.hbm %s2178_s11, 32 }
 0x33c   : > { %p1774_p4 = scmp.ne.s32.totalorder %s2132_s18, %s1773_s13  ;;  %p1778_p9 = scmp.lt.s32.totalorder %s2132_s18, %s2178_s11 }
 0x33d   : > { %p1779_p10 = scmp.lt.s32.totalorder %s1777_s16, %s1773_s13 }
 0x33e   : > { %p1775_p7 = pnand %p1774_p4, %p1923_p5 }
 0x33f   : > { %p1780_p11 = por %p1779_p10, %p1778_p9 }
 0x340   : > { %p1776_p8 = pneg %p1775_p7 }
 0x342   : > { %p1781_p12 = pnand %p1780_p11, %p1776_p8 }
 0x344   : > { %1784 = shalt.err (!%p1781_p12)
}
 0x345   : > { %1699 = dma.vmem_to_hbm [thread:$0]  (%p1923_p5), %s1381_s15, 16, %s2132_s18, %s1368_s10  }
 0x346 PF: > { %p1705_p13 = scmp.ge.s32.totalorder %s1819_s22, 2  ;;  %s1392_s23 = sand.u32 1, %s1807_s19  }
 0x347   : > { %s1393_s30 = scalar_lea.sflag [#allocation4], %s1392_s23 }
 0x348   : > { %p1702_p0 = pnand %p1705_p13, %p1927_p6 }
 0x34a   : > { %p1703_p1 = pneg %p1702_p0 }
 0x34c   : > { %1802 = dma.done.wait (%p1703_p1), %s1393_s30, 16  }
 0x34d   : > { %1804 = vsyncadd (%p1703_p1), %s1393_s30, 4294967280  ;;  %p23_p2 = scmp.ge.s32.totalorder %s1911_s24, 4   ;;  %s2181_s19 = smov %s1811_s20 }
 0x34e   : > { %s2182_s20 = smov %s1815_s21  ;;  %s2183_s21 = smov %s1921_s27 }
 0x34f   : > { %s2184_s22 = smov %s1911_s24  ;;  %25 = sbr.rel (!%p23_p2) target bundleno = 6 (0x6), region = 105 }
 0x354   :  { %1397 = vsyncpa [#allocation4], 1 }
 0x355   :  { %1399 = vsyncpa [#allocation4 + $0x1], 1 }

</bundles_post_ra>
